<compile_context>
chip_gen: v6e
topology: v6e:2x2x1
jax: 0.10.0
libtpu: 0.0.40
codegen_flags: <defaults>
</compile_context>

<pallas_src>
import math

import jax
import jax.numpy as jnp
import numpy as np
from jax.experimental import pallas as pl
from jax.experimental.pallas import tpu as pltpu

_NEG_BIG = -1e30  # pad logit for unused output lanes


def _lstm_seq_kernel(xproj_ref, h0_ref, c0_ref, w_ref, by_ref,
                     logits_ref, h_out_ref, c_out_ref,
                     h_scr, c_scr):
    t = pl.program_id(0)
    B, S = h0_ref.shape
    G = 4 * S
    Tc = xproj_ref.shape[0]

    @pl.when(t == 0)
    def _init():
        h_scr[...] = h0_ref[...]
        c_scr[...] = c0_ref[...]

    h = h_scr[...]              # (B, S) f32 carried state (stays in vregs in-chunk)
    c = c_scr[...]
    by = by_ref[...]            # (1, Ipad) f32

    # Fully-unrolled static inner loop over the Tc timesteps of this chunk.
    for i in range(Tc):
        # Single fused recurrent matmul: h @ [W_hh | Wy^T]  (bf16 MXU, f32 acc)
        fused = jnp.dot(h.astype(w_ref.dtype), w_ref[...],
                        preferred_element_type=jnp.float32)     # (B, 4S + Ipad)

        # Gate pre-activations: x-projection (with bias folded in) was computed
        # outside the serial loop and streamed in per chunk.
        gates = xproj_ref[i] + fused[:, :G]                     # (B, 4S) f32

        # Output logits use the step's INCOMING h (reference-module semantics).
        logits_ref[i] = by + fused[:, G:]                       # (B, Ipad) f32

        hf = jax.nn.sigmoid(gates[:, 0 * S:1 * S])
        hi = jax.nn.sigmoid(gates[:, 1 * S:2 * S])
        ho = jax.nn.sigmoid(gates[:, 2 * S:3 * S])
        hc = jnp.tanh(gates[:, 3 * S:4 * S])
        c = hf * c + hi * hc
        h = ho * jnp.tanh(c)

    # Carry state to the next chunk (one scratch store per chunk, not per step).
    h_scr[...] = h
    c_scr[...] = c

    @pl.when(t == pl.num_programs(0) - 1)
    def _finalize():
        h_out_ref[...] = h.astype(h_out_ref.dtype)
        c_out_ref[...] = c.astype(c_out_ref.dtype)


def prepare_lstm_params(weights, Wy, bias, by, matmul_dtype=jnp.bfloat16):
    """One-time weight prep: split W into W_xh / W_hh, pack Wy^T into the
    recurrent matrix, transpose, bf16-cast, lane-pad the output projection."""
    weights = jnp.asarray(weights, jnp.float32)
    Wy = jnp.asarray(Wy, jnp.float32)
    four_s, s_plus_i = weights.shape
    S = four_s // 4
    I = s_plus_i - S
    Ipad = ((I + 127) // 128) * 128

    # torch.addmm(bias, concat([old_h, x], 1), weights.T):
    #   weights[:, :S] multiplies h, weights[:, S:] multiplies x.
    w_hh = weights[:, :S].T                                      # (S, 4S)
    w_xh = weights[:, S:].T                                      # (I, 4S)

    wy_t = jnp.zeros((S, Ipad), jnp.float32).at[:, :I].set(Wy.T)  # (S, Ipad)
    w_rec = jnp.concatenate([w_hh, wy_t], axis=1).astype(matmul_dtype)  # (S, 4S+Ipad)

    by_pad = (jnp.full((1, Ipad), _NEG_BIG, jnp.float32)
              .at[0, :I].set(jnp.asarray(by, jnp.float32)))       # (1, Ipad)

    return dict(
        w_rec=w_rec,
        w_xh=w_xh.astype(matmul_dtype),
        bias=jnp.asarray(bias, jnp.float32).reshape(1, 4 * S),
        by=by_pad,
        S=S, I=I, Ipad=Ipad,
    )


def _pick_chunk(T, max_chunk=8):
    """Largest chunk size <= max_chunk that evenly divides T."""
    for tc in range(min(T, max_chunk), 0, -1):
        if T % tc == 0:
            return tc
    return 1


def lstm_forward_seq(xs, h0, c0, params, max_chunk=8):
    """Run T LSTM-cell steps: parallel x-projection, ONE pallas_call over the
    serial recurrence (Tc timesteps per grid step), parallel softmax."""
    T, B, I = xs.shape
    S, Ipad = params["S"], params["Ipad"]
    G = 4 * S
    assert I == params["I"] and h0.shape == (B, S) and c0.shape == (B, S)

    Tc = _pick_chunk(T, max_chunk)
    n_chunks = T // Tc

    # ---- Phase 1 (parallel, hoisted out of the recurrence): x-projection ----
    # One big well-shaped matmul, bias folded in.  bf16 MXU, f32 accumulate.
    xproj = (jnp.dot(xs.reshape(T * B, I).astype(params["w_xh"].dtype),
                     params["w_xh"], preferred_element_type=jnp.float32)
             + params["bias"]).reshape(T, B, G)

    const = lambda t: (0, 0)  # constant block -> fetched once, VMEM-resident
    grid_spec = pltpu.PrefetchScalarGridSpec(
        num_scalar_prefetch=0,
        grid=(n_chunks,),
        in_specs=[
            pl.BlockSpec((Tc, B, G), lambda t: (t, 0, 0)),     # xproj chunk
            pl.BlockSpec((B, S), const),                       # h0
            pl.BlockSpec((B, S), const),                       # c0
            pl.BlockSpec((S, G + Ipad), const),                # [W_hh | Wy^T] bf16
            pl.BlockSpec((1, Ipad), const),                    # by (padded)
        ],
        out_specs=(
            pl.BlockSpec((Tc, B, Ipad), lambda t: (t, 0, 0)),  # logits (lane-dense)
            pl.BlockSpec((B, S), const),                       # final new_h
            pl.BlockSpec((B, S), const),                       # final new_c
        ),
        scratch_shapes=[
            pltpu.VMEM((B, S), jnp.float32),                   # h carry
            pltpu.VMEM((B, S), jnp.float32),                   # c carry
        ],
    )

    # ---- Phase 2 (serial recurrence) ----
    logits_pad, new_h, new_c = pl.pallas_call(
        _lstm_seq_kernel,
        out_shape=(
            jax.ShapeDtypeStruct((T, B, Ipad), jnp.float32),
            jax.ShapeDtypeStruct((B, S), jnp.float32),
            jax.ShapeDtypeStruct((B, S), jnp.float32),
        ),
        grid_spec=grid_spec,
        compiler_params=pltpu.CompilerParams(
            dimension_semantics=("arbitrary",),   # the recurrence is sequential
            vmem_limit_bytes=32 * 1024 * 1024,    # explicit; safe on v5e/v6e/v7x
        ),
    )(xproj, h0, c0, params["w_rec"], params["by"])

    # ---- Phase 3 (parallel, off the serial path): softmax over all T*B rows.
    # XLA fuses the slice + softmax into a single pass over the padded logits.
    probs = jax.nn.softmax(logits_pad[:, :, :I], axis=-1)
    return probs, new_h, new_c


def lstm_forward(x, old_h, old_c, params):
    """Single LSTM-cell step: the original module's forward semantics."""
    probs, new_h, new_c = lstm_forward_seq(x[None], old_h, old_c, params)
    return probs[0], new_h, new_c


# ------------------------- pure-JAX references -------------------------

def lstm_cell_ref(x, h, c, weights, Wy, bias, by, matmul_dtype=jnp.bfloat16):
    md = matmul_dtype
    S = h.shape[1]
    Xcat = jnp.concatenate([h, x], axis=1)
    gw = bias[None, :] + jnp.dot(Xcat.astype(md), weights.T.astype(md),
                                 preferred_element_type=jnp.float32)
    hf = jax.nn.sigmoid(gw[:, 0 * S:1 * S])
    hi = jax.nn.sigmoid(gw[:, 1 * S:2 * S])
    ho = jax.nn.sigmoid(gw[:, 2 * S:3 * S])
    hc = jnp.tanh(gw[:, 3 * S:4 * S])
    new_c = hf * c + hi * hc
    new_h = ho * jnp.tanh(new_c)
    y = by[None, :] + jnp.dot(h.astype(md), Wy.T.astype(md),
                              preferred_element_type=jnp.float32)
    prob = jax.nn.softmax(y, axis=-1)
    return prob, new_h, new_c


def lstm_seq_ref(xs, h0, c0, weights, Wy, bias, by, matmul_dtype=jnp.bfloat16):
    h, c = h0, c0
    probs = []
    for t in range(xs.shape[0]):
        p, h, c = lstm_cell_ref(xs[t], h, c, weights, Wy, bias, by, matmul_dtype)
        probs.append(p)
    return jnp.stack(probs), h, c


# TODO(synk): the autograd backward pass (lstm_cpp.backward / ctx.save_for_backward
# cache) is not implemented; only the forward pass is translated.

if __name__ == "__main__":
    batch_size = 16
    input_features = 32
    state_size = 128
    seq_len = 16          # exercises chunking: Tc=8 -> grid of 2 chunks

    key = jax.random.PRNGKey(0)
    kx, kxs, kh, kc, kw, kwy, kb, kby = jax.random.split(key, 8)

    x = jax.random.normal(kx, (batch_size, input_features), jnp.float32)
    xs = jax.random.normal(kxs, (seq_len, batch_size, input_features), jnp.float32)
    old_h = jax.random.normal(kh, (batch_size, state_size), jnp.float32)
    old_c = jax.random.normal(kc, (batch_size, state_size), jnp.float32)

    # Parameters: uniform(-stdv, stdv), stdv = 1/sqrt(state_size), like reset_parameters().
    stdv = 1.0 / math.sqrt(state_size)
    weights = jax.random.uniform(kw, (4 * state_size, input_features + state_size),
                                 jnp.float32, minval=-stdv, maxval=stdv)
    Wy = jax.random.uniform(kwy, (input_features, state_size), jnp.float32,
                            minval=-stdv, maxval=stdv)
    bias = jax.random.uniform(kb, (4 * state_size,), jnp.float32,
                              minval=-stdv, maxval=stdv)
    by = jax.random.uniform(kby, (input_features,), jnp.float32,
                            minval=-stdv, maxval=stdv)

    params = prepare_lstm_params(weights, Wy, bias, by)   # one-time weight prep

    # --- single cell step: matches the original module's forward ---
    prob, new_h, new_c = jax.block_until_ready(lstm_forward(x, old_h, old_c, params))
    prob_r, new_h_r, new_c_r = lstm_cell_ref(x, old_h, old_c, weights, Wy, bias, by)
    np.testing.assert_allclose(np.asarray(prob), np.asarray(prob_r), atol=2e-3, rtol=2e-3)
    np.testing.assert_allclose(np.asarray(new_h), np.asarray(new_h_r), atol=2e-3, rtol=2e-3)
    np.testing.assert_allclose(np.asarray(new_c), np.asarray(new_c_r), atol=2e-3, rtol=2e-3)

    # --- fused recurrence: seq_len cell steps (chunked) inside one pallas_call ---
    probs, hT, cT = jax.block_until_ready(lstm_forward_seq(xs, old_h, old_c, params))
    probs_r, hT_r, cT_r = lstm_seq_ref(xs, old_h, old_c, weights, Wy, bias, by)
    np.testing.assert_allclose(np.asarray(probs), np.asarray(probs_r), atol=5e-3, rtol=5e-3)
    np.testing.assert_allclose(np.asarray(hT), np.asarray(hT_r), atol=5e-3, rtol=5e-3)
    np.testing.assert_allclose(np.asarray(cT), np.asarray(cT_r), atol=5e-3, rtol=5e-3)

    print("KERNEL_OK")
</pallas_src>

<mosaic_0001>
module attributes {stable_mosaic.version = 11 : i64} {
  func.func @_lstm_seq_kernel(%arg0: i32, %arg1: memref<1x16x512xf32, #tpu.memory_space<vmem>>, %arg2: memref<16x128xf32, #tpu.memory_space<vmem>>, %arg3: memref<16x128xf32, #tpu.memory_space<vmem>>, %arg4: memref<128x640xbf16, #tpu.memory_space<vmem>>, %arg5: memref<1x128xf32, #tpu.memory_space<vmem>>, %arg6: memref<1x16x128xf32, #tpu.memory_space<vmem>>, %arg7: memref<16x128xf32, #tpu.memory_space<vmem>>, %arg8: memref<16x128xf32, #tpu.memory_space<vmem>>, %arg9: memref<16x128xf32, #tpu.memory_space<vmem>>, %arg10: memref<16x128xf32, #tpu.memory_space<vmem>>) attributes {dimension_semantics = [#tpu.dimension_semantics<arbitrary>], iteration_bounds = array<i64: 1>, scalar_prefetch = 0 : i64, scratch_operands = 2 : i64, tpu.core_type = #tpu.core_type<tc>, window_params = [{transform_indices = @transform_0, window_bounds = array<i64: 1, 16, 512>}, {pipeline_mode = #tpu.pipeline_mode<synchronous>, transform_indices = @transform_1, window_bounds = array<i64: 16, 128>}, {pipeline_mode = #tpu.pipeline_mode<synchronous>, transform_indices = @transform_2, window_bounds = array<i64: 16, 128>}, {pipeline_mode = #tpu.pipeline_mode<synchronous>, transform_indices = @transform_3, window_bounds = array<i64: 128, 640>}, {pipeline_mode = #tpu.pipeline_mode<synchronous>, transform_indices = @transform_4, window_bounds = array<i64: 1, 128>}, {transform_indices = @transform_5, window_bounds = array<i64: 1, 16, 128>}, {pipeline_mode = #tpu.pipeline_mode<synchronous>, transform_indices = @transform_6, window_bounds = array<i64: 16, 128>}, {pipeline_mode = #tpu.pipeline_mode<synchronous>, transform_indices = @transform_7, window_bounds = array<i64: 16, 128>}]} {
    %c0_i32 = arith.constant 0 : i32
    %0 = arith.cmpi eq, %arg0, %c0_i32 : i32
    %1 = arith.extui %0 : i1 to i32
    %c0_i32_0 = arith.constant 0 : i32
    %2 = arith.cmpi ne, %1, %c0_i32_0 : i32
    scf.if %2 {
      %c0_23 = arith.constant 0 : index
      %c0_24 = arith.constant 0 : index
      %49 = vector.load %arg2[%c0_23, %c0_24] : memref<16x128xf32, #tpu.memory_space<vmem>>, vector<16x128xf32>
      %c0_25 = arith.constant 0 : index
      %c0_26 = arith.constant 0 : index
      %50 = vector.load %arg9[%c0_25, %c0_26] : memref<16x128xf32, #tpu.memory_space<vmem>>, vector<16x128xf32>
      tpu.vector_store %arg9[%c0_25, %c0_26], %49 {strides = array<i32>} : memref<16x128xf32, #tpu.memory_space<vmem>>, vector<16x128xf32>,
      %c0_27 = arith.constant 0 : index
      %c0_28 = arith.constant 0 : index
      %51 = vector.load %arg3[%c0_27, %c0_28] : memref<16x128xf32, #tpu.memory_space<vmem>>, vector<16x128xf32>
      %c0_29 = arith.constant 0 : index
      %c0_30 = arith.constant 0 : index
      %52 = vector.load %arg10[%c0_29, %c0_30] : memref<16x128xf32, #tpu.memory_space<vmem>>, vector<16x128xf32>
      tpu.vector_store %arg10[%c0_29, %c0_30], %51 {strides = array<i32>} : memref<16x128xf32, #tpu.memory_space<vmem>>, vector<16x128xf32>,
    } else {
    }
    %c0 = arith.constant 0 : index
    %c0_1 = arith.constant 0 : index
    %3 = vector.load %arg9[%c0, %c0_1] : memref<16x128xf32, #tpu.memory_space<vmem>>, vector<16x128xf32>
    %c0_2 = arith.constant 0 : index
    %c0_3 = arith.constant 0 : index
    %4 = vector.load %arg10[%c0_2, %c0_3] : memref<16x128xf32, #tpu.memory_space<vmem>>, vector<16x128xf32>
    %c0_4 = arith.constant 0 : index
    %c0_5 = arith.constant 0 : index
    %5 = vector.load %arg5[%c0_4, %c0_5] : memref<1x128xf32, #tpu.memory_space<vmem>>, vector<1x128xf32>
    %6 = arith.truncf %3 : vector<16x128xf32> to vector<16x128xbf16>
    %c0_6 = arith.constant 0 : index
    %c0_7 = arith.constant 0 : index
    %7 = vector.load %arg4[%c0_6, %c0_7] : memref<128x640xbf16, #tpu.memory_space<vmem>>, vector<128x640xbf16>
    %cst = arith.constant dense<0.000000e+00> : vector<16x640xf32>
    %8 = tpu.matmul %6, %7, %cst {dimension_numbers = #tpu.dot_dimension_numbers<[1], [0], [0], [1], [0, 0, 1, 1], [], []>} : vector<16x128xbf16>, vector<128x640xbf16>, vector<16x640xf32> -> vector<16x640xf32>
    %c0_8 = arith.constant 0 : index
    %c0_9 = arith.constant 0 : index
    %c0_10 = arith.constant 0 : index
    %9 = vector.load %arg1[%c0_8, %c0_9, %c0_10] : memref<1x16x512xf32, #tpu.memory_space<vmem>>, vector<1x16x512xf32>
    %10 = vector.shape_cast %9 : vector<1x16x512xf32> to vector<16x512xf32>
    %11 = vector.extract_strided_slice %8 {offsets = [0, 0], sizes = [16, 512], strides = [1, 1]} : vector<16x640xf32> to vector<16x512xf32>
    %12 = arith.addf %10, %11 : vector<16x512xf32>
    %13 = vector.extract_strided_slice %8 {offsets = [0, 512], sizes = [16, 128], strides = [1, 1]} : vector<16x640xf32> to vector<16x128xf32>
    %14 = vector.broadcast %5 : vector<1x128xf32> to vector<16x128xf32>
    %15 = arith.addf %14, %13 : vector<16x128xf32>
    %c0_11 = arith.constant 0 : index
    %c0_12 = arith.constant 0 : index
    %c0_13 = arith.constant 0 : index
    %16 = vector.load %arg6[%c0_11, %c0_12, %c0_13] : memref<1x16x128xf32, #tpu.memory_space<vmem>>, vector<1x16x128xf32>
    %17 = vector.shape_cast %16 : vector<1x16x128xf32> to vector<16x128xf32>
    %18 = vector.shape_cast %15 : vector<16x128xf32> to vector<1x16x128xf32>
    tpu.vector_store %arg6[%c0_11, %c0_12, %c0_13], %18 {strides = array<i32>} : memref<1x16x128xf32, #tpu.memory_space<vmem>>, vector<1x16x128xf32>,
    %19 = vector.extract_strided_slice %12 {offsets = [0, 0], sizes = [16, 128], strides = [1, 1]} : vector<16x512xf32> to vector<16x128xf32>
    %20 = arith.negf %19 : vector<16x128xf32>
    %21 = math.exp %20 : vector<16x128xf32>
    %cst_14 = arith.constant 1.000000e+00 : f32
    %22 = vector.broadcast %cst_14 : f32 to vector<16x128xf32>
    %23 = arith.addf %22, %21 : vector<16x128xf32>
    %24 = arith.divf %22, %23 : vector<16x128xf32>
    %25 = vector.extract_strided_slice %12 {offsets = [0, 128], sizes = [16, 128], strides = [1, 1]} : vector<16x512xf32> to vector<16x128xf32>
    %26 = arith.negf %25 : vector<16x128xf32>
    %27 = math.exp %26 : vector<16x128xf32>
    %cst_15 = arith.constant 1.000000e+00 : f32
    %28 = vector.broadcast %cst_15 : f32 to vector<16x128xf32>
    %29 = arith.addf %28, %27 : vector<16x128xf32>
    %30 = arith.divf %28, %29 : vector<16x128xf32>
    %31 = vector.extract_strided_slice %12 {offsets = [0, 256], sizes = [16, 128], strides = [1, 1]} : vector<16x512xf32> to vector<16x128xf32>
    %32 = arith.negf %31 : vector<16x128xf32>
    %33 = math.exp %32 : vector<16x128xf32>
    %cst_16 = arith.constant 1.000000e+00 : f32
    %34 = vector.broadcast %cst_16 : f32 to vector<16x128xf32>
    %35 = arith.addf %34, %33 : vector<16x128xf32>
    %36 = arith.divf %34, %35 : vector<16x128xf32>
    %37 = vector.extract_strided_slice %12 {offsets = [0, 384], sizes = [16, 128], strides = [1, 1]} : vector<16x512xf32> to vector<16x128xf32>
    %38 = math.tanh %37 : vector<16x128xf32>
    %39 = arith.mulf %24, %4 : vector<16x128xf32>
    %40 = arith.mulf %30, %38 : vector<16x128xf32>
    %41 = arith.addf %39, %40 : vector<16x128xf32>
    %42 = math.tanh %41 : vector<16x128xf32>
    %43 = arith.mulf %36, %42 : vector<16x128xf32>
    %c0_17 = arith.constant 0 : index
    %c0_18 = arith.constant 0 : index
    %44 = vector.load %arg9[%c0_17, %c0_18] : memref<16x128xf32, #tpu.memory_space<vmem>>, vector<16x128xf32>
    tpu.vector_store %arg9[%c0_17, %c0_18], %43 {strides = array<i32>} : memref<16x128xf32, #tpu.memory_space<vmem>>, vector<16x128xf32>,
    %c0_19 = arith.constant 0 : index
    %c0_20 = arith.constant 0 : index
    %45 = vector.load %arg10[%c0_19, %c0_20] : memref<16x128xf32, #tpu.memory_space<vmem>>, vector<16x128xf32>
    tpu.vector_store %arg10[%c0_19, %c0_20], %41 {strides = array<i32>} : memref<16x128xf32, #tpu.memory_space<vmem>>, vector<16x128xf32>,
    %c0_i32_21 = arith.constant 0 : i32
    %46 = arith.cmpi eq, %arg0, %c0_i32_21 : i32
    %47 = arith.extui %46 : i1 to i32
    %c0_i32_22 = arith.constant 0 : i32
    %48 = arith.cmpi ne, %47, %c0_i32_22 : i32
    scf.if %48 {
      %c0_23 = arith.constant 0 : index
      %c0_24 = arith.constant 0 : index
      %49 = vector.load %arg7[%c0_23, %c0_24] : memref<16x128xf32, #tpu.memory_space<vmem>>, vector<16x128xf32>
      tpu.vector_store %arg7[%c0_23, %c0_24], %43 {strides = array<i32>} : memref<16x128xf32, #tpu.memory_space<vmem>>, vector<16x128xf32>,
      %c0_25 = arith.constant 0 : index
      %c0_26 = arith.constant 0 : index
      %50 = vector.load %arg8[%c0_25, %c0_26] : memref<16x128xf32, #tpu.memory_space<vmem>>, vector<16x128xf32>
      tpu.vector_store %arg8[%c0_25, %c0_26], %41 {strides = array<i32>} : memref<16x128xf32, #tpu.memory_space<vmem>>, vector<16x128xf32>,
    } else {
    }
    return
  }
  func.func @transform_0(%arg0: i32) -> (i32, i32, i32) {
    %c0_i32 = arith.constant 0 : i32
    %c0_i32_0 = arith.constant 0 : i32
    %c0_i32_1 = arith.constant 0 : i32
    return %arg0, %c0_i32, %c0_i32_0 : i32, i32, i32
  }
  func.func @transform_1(%arg0: i32) -> (i32, i32) {
    %c0_i32 = arith.constant 0 : i32
    %c0_i32_0 = arith.constant 0 : i32
    %c0_i32_1 = arith.constant 0 : i32
    return %c0_i32, %c0_i32_0 : i32, i32
  }
  func.func @transform_2(%arg0: i32) -> (i32, i32) {
    %c0_i32 = arith.constant 0 : i32
    %c0_i32_0 = arith.constant 0 : i32
    %c0_i32_1 = arith.constant 0 : i32
    return %c0_i32, %c0_i32_0 : i32, i32
  }
  func.func @transform_3(%arg0: i32) -> (i32, i32) {
    %c0_i32 = arith.constant 0 : i32
    %c0_i32_0 = arith.constant 0 : i32
    %c0_i32_1 = arith.constant 0 : i32
    return %c0_i32, %c0_i32_0 : i32, i32
  }
  func.func @transform_4(%arg0: i32) -> (i32, i32) {
    %c0_i32 = arith.constant 0 : i32
    %c0_i32_0 = arith.constant 0 : i32
    %c0_i32_1 = arith.constant 0 : i32
    return %c0_i32, %c0_i32_0 : i32, i32
  }
  func.func @transform_5(%arg0: i32) -> (i32, i32, i32) {
    %c0_i32 = arith.constant 0 : i32
    %c0_i32_0 = arith.constant 0 : i32
    %c0_i32_1 = arith.constant 0 : i32
    return %arg0, %c0_i32, %c0_i32_0 : i32, i32, i32
  }
  func.func @transform_6(%arg0: i32) -> (i32, i32) {
    %c0_i32 = arith.constant 0 : i32
    %c0_i32_0 = arith.constant 0 : i32
    %c0_i32_1 = arith.constant 0 : i32
    return %c0_i32, %c0_i32_0 : i32, i32
  }
  func.func @transform_7(%arg0: i32) -> (i32, i32) {
    %c0_i32 = arith.constant 0 : i32
    %c0_i32_0 = arith.constant 0 : i32
    %c0_i32_1 = arith.constant 0 : i32
    return %c0_i32, %c0_i32_0 : i32, i32
  }
}

</mosaic_0001>

<bundles_post_ra>
// kernel: tpu_custom_call.1
= control target key start
LH: loop header
LB: loop body
LE: loop exit
PB: predicated region body
PF: predicated region fallthrough
CT: control target
= control target key end

     0   :  { %13 = vsyncpa [#allocation5], 0  ;;  %s1042_s0 = inlined_call_operand.hbm [shape: f32[1,16,512], index: 0, kind: input, shape index: {}]   ;;  %s1043_s1 = inlined_call_operand.hbm [shape: f32[16,128], index: 1, kind: input, shape index: {}]   ;;  %s1044_s2 = inlined_call_operand.hbm [shape: f32[16,128], index: 2, kind: input, shape index: {}]   ;;  %s1045_s3 = inlined_call_operand.hbm [shape: bf16[128,640], index: 3, kind: input, shape index: {}]   ;;  %s1046_s4 = inlined_call_operand.vmem [shape: f32[1,128], index: 4, kind: input, shape index: {}]   ;;  %s1047_s5 = inlined_call_operand.hbm [shape: f32[1,16,128], index: 5, kind: output, shape index: {0}]   ;;  %s1048_s6 = inlined_call_operand.hbm [shape: f32[16,128], index: 6, kind: output, shape index: {1}]   ;;  %s1049_s7 = inlined_call_operand.hbm [shape: f32[16,128], index: 7, kind: output, shape index: {2}]  }
   0x1   :  { %14 = vsyncpa [#allocation8], 0 }
   0x2   :  { %15 = vsyncpa [#allocation11], 0 }
   0x3   :  { %16 = vsyncpa [#allocation6], 0 }
   0x4   :  { %17 = vsyncpa [#allocation14], 0  ;;  %s947_s24 = smov [#allocation7]  }
   0x5   :  { %s35_s25 = sshll.u32 %s947_s24, 4  ;;  %s36_s25 = int_to_ptr.vmem [resolvable:$true] %s35_s25 }
   0x6   :  { %s805_s26 = scalar_lea.vmem %s36_s25, 256  ;;  %p810_p1 = scmp.lt.s32.totalorder %s36_s25, %s36_s25 }
   0x7   :  { %p806_p0 = scmp.ne.s32.totalorder %s36_s25, %s805_s26  ;;  %p811_p2 = scmp.lt.s32.totalorder %s805_s26, %s805_s26 }
   0x9   :  { %p812_p3 = por %p811_p2, %p810_p1 }
   0xb   :  { %p813_p4 = pnand %p812_p3, %p806_p0 }
   0xd   :  { %816 = shalt.err (!%p813_p4)
}
   0xe   :  { %s948_s27 = smov 128   ;;  %s949_s28 = smov 8  }
   0xf   :  { %41 = dma.hbm_to_vmem [thread:$0]  %s1043_s1, 256, %s36_s25, [#allocation8], %s948_s27, %s948_s27, %s949_s28  }
  0x10   :  { %s950_s8 = smov [#allocation4]  }
  0x11   :  { %s23_s9 = sshll.u32 %s950_s8, 4  ;;  %s24_s9 = int_to_ptr.vmem [resolvable:$true] %s23_s9 }
  0x12   :  { %s825_s10 = scalar_lea.vmem %s24_s9, 1024  ;;  %p830_p6 = scmp.lt.s32.totalorder %s24_s9, %s24_s9 }
  0x13   :  { %p826_p5 = scmp.ne.s32.totalorder %s24_s9, %s825_s10  ;;  %p831_p7 = scmp.lt.s32.totalorder %s825_s10, %s825_s10 }
  0x15   :  { %p832_p8 = por %p831_p7, %p830_p6 }
  0x17   :  { %p833_p9 = pnand %p832_p8, %p826_p5 }
  0x19   :  { %836 = shalt.err (!%p833_p9)
}
  0x1a   :  { %s951_s11 = smov 512   ;;  %s952_s12 = smov 32  }
  0x1b   :  { %29 = dma.hbm_to_vmem [thread:$0]  %s1042_s0, 1024, %s24_s9, [#allocation5], %s951_s11, %s951_s11, %s952_s12  }
  0x1c   :  { %s953_s15 = smov [#allocation9]   ;;  %s954_s17 = smov [#allocation10]  }
  0x1d   :  { %s47_s16 = sshll.u32 %s953_s15, 4  ;;  %s59_s1 = sshll.u32 %s954_s17, 4  ;;  %s48_s16 = int_to_ptr.vmem [resolvable:$true] %s47_s16  ;;  %s60_s1 = int_to_ptr.vmem [resolvable:$true] %s59_s1 }
  0x1e   :  { %s845_s18 = scalar_lea.vmem %s48_s16, 256  ;;  %p850_p11 = scmp.lt.s32.totalorder %s48_s16, %s48_s16 }
  0x1f   :  { %p846_p10 = scmp.ne.s32.totalorder %s48_s16, %s845_s18  ;;  %p851_p12 = scmp.lt.s32.totalorder %s845_s18, %s845_s18 }
  0x21   :  { %p852_p13 = por %p851_p12, %p850_p11 }
  0x23   :  { %p853_p0 = pnand %p852_p13, %p846_p10 }
  0x25   :  { %856 = shalt.err (!%p853_p0)
}
  0x26   :  { %53 = dma.hbm_to_vmem [thread:$0]  %s1044_s2, 256, %s48_s16, [#allocation8], %s948_s27, %s948_s27, %s949_s28  }
  0x27   :  { %s865_s0 = scalar_lea.vmem %s60_s1, 5120  ;;  %p870_p2 = scmp.lt.s32.totalorder %s60_s1, %s60_s1 }
  0x28   :  { %p866_p1 = scmp.ne.s32.totalorder %s60_s1, %s865_s0  ;;  %p871_p3 = scmp.lt.s32.totalorder %s865_s0, %s865_s0 }
  0x2a   :  { %p872_p4 = por %p871_p3, %p870_p2 }
  0x2c   :  { %p873_p5 = pnand %p872_p4, %p866_p1 }
  0x2e   :  { %876 = shalt.err (!%p873_p5)
}
  0x2f   :  { %s955_s21 = smov 320   ;;  %s956_s22 = smov 20  }
  0x30   :  { %65 = dma.hbm_to_vmem [thread:$0]  %s1045_s3, 5120, %s60_s1, [#allocation11], %s955_s21, %s955_s21, %s956_s22  }
  0x31   :  { %937 = dma.done.wait [#allocation5], 1024  }
  0x32   :  { %938 = vsyncadd [#allocation5], 4294966272 }
  0x33   :  { %939 = dma.done.wait [#allocation8], 512  }
  0x34   :  { %940 = vsyncadd [#allocation8], 4294966784 }
  0x35   :  { %941 = dma.done.wait [#allocation11], 5120  }
  0x36   :  { %942 = vsyncadd [#allocation11], 4294962176  ;;  %v957_v0 = vmov 0   ;;  %v709_v1 = vld [vmem:[#allocation10 + $0x11c] ss:$20 sps:$4 sm:$0xff]   ;;  %v85_v30 = vld [vmem:[#allocation7] sm:$0xff] }
  0x37   :  { %387 = vmatprep.mubr.bf16.mxu0 %v957_v0  ;;  %430 = vmatprep.mubr.bf16.mxu1 %v957_v0  ;;  %v711_v2 = vld [vmem:[#allocation10 + $0x118] ss:$20 sps:$4 sm:$0xff]   ;;  %v712_v3 = vld [vmem:[#allocation10 + $0xf4] ss:$20 sps:$4 sm:$0xff]   ;;  %v714_v4 = vld [vmem:[#allocation10 + $0xf0] ss:$20 sps:$4 sm:$0xff]  }
  0x38   :  { %355 = vmatprep.subr.bf16.mxu0 %v709_v1  ;;  %v715_v5 = vld [vmem:[#allocation10 + $0xcc] ss:$20 sps:$4 sm:$0xff]   ;;  %v720_v6 = vld [vmem:[#allocation10 + $0x124] ss:$20 sps:$4 sm:$0xff]   ;;  %v717_v8 = vld [vmem:[#allocation10 + $0xc8] ss:$20 sps:$4 sm:$0xff]  }
  0x39   :  { %356 = vmatpush1.bf16.msra.mxu0 %v711_v2  ;;  %v723_v7 = vld [vmem:[#allocation10 + $0x120] ss:$20 sps:$4 sm:$0xff]   ;;  %398 = vmatprep.subr.bf16.mxu1 %v720_v6  ;;  %v718_v9 = vld [vmem:[#allocation10 + $0xa4] ss:$20 sps:$4 sm:$0xff]   ;;  %v726_v10 = vld [vmem:[#allocation10 + $0xfc] ss:$20 sps:$4 sm:$0xff]  }
  0x3a   :  { %357 = vmatprep.subr.bf16.mxu0 %v712_v3  ;;  %399 = vmatpush1.bf16.msra.mxu1 %v723_v7  ;;  %v729_v11 = vld [vmem:[#allocation10 + $0xf8] ss:$20 sps:$4 sm:$0xff]   ;;  %v722_v12 = vld [vmem:[#allocation10 + $0xa0] ss:$20 sps:$4 sm:$0xff]   ;;  %v724_v13 = vld [vmem:[#allocation10 + $0x7c] ss:$20 sps:$4 sm:$0xff]  }
  0x3b   :  { %400 = vmatprep.subr.bf16.mxu1 %v726_v10  ;;  %v732_v14 = vld [vmem:[#allocation10 + $0xd4] ss:$20 sps:$4 sm:$0xff]   ;;  %v735_v15 = vld [vmem:[#allocation10 + $0xd0] ss:$20 sps:$4 sm:$0xff]   ;;  %v738_v16 = vld [vmem:[#allocation10 + $0xac] ss:$20 sps:$4 sm:$0xff]  }
  0x3c   :  { %v728_v17 = vld [vmem:[#allocation10 + $0x78] ss:$20 sps:$4 sm:$0xff]   ;;  %v730_v18 = vld [vmem:[#allocation10 + $0x54] ss:$20 sps:$4 sm:$0xff]   ;;  %v734_v21 = vld [vmem:[#allocation10 + $0x50] ss:$20 sps:$4 sm:$0xff]  }
  0x3d   :  { %358 = vmatpush1.bf16.msra.mxu0 %v714_v4  ;;  %v741_v19 = vld [vmem:[#allocation10 + $0xa8] ss:$20 sps:$4 sm:$0xff]   ;;  %v744_v20 = vld [vmem:[#allocation10 + $0x84] ss:$20 sps:$4 sm:$0xff]   ;;  %v736_v22 = vld [vmem:[#allocation10 + $0x2c] ss:$20 sps:$4 sm:$0xff]  }
  0x3e   :  { %359 = vmatprep.subr.bf16.mxu0 %v715_v5  ;;  %401 = vmatpush1.bf16.msra.mxu1 %v729_v11  ;;  %v747_v23 = vld [vmem:[#allocation10 + $0x80] ss:$20 sps:$4 sm:$0xff]   ;;  %v748_v24 = vld [vmem:[#allocation10 + $0x5c] ss:$20 sps:$4 sm:$0xff]   ;;  %v742_v26 = vld [vmem:[#allocation10 + $0x4] ss:$20 sps:$4 sm:$0xff]  }
  0x3f   :  { %402 = vmatprep.subr.bf16.mxu1 %v732_v14  ;;  %v740_v25 = vld [vmem:[#allocation10 + $0x28] ss:$20 sps:$4 sm:$0xff]   ;;  %v750_v27 = vld [vmem:[#allocation10 + $0x58] ss:$20 sps:$4 sm:$0xff]   ;;  %v746_v28 = vld [vmem:[#allocation10] ss:$20 sps:$4 sm:$0xff]  }
  0x40   :  { %v751_v29 = vld [vmem:[#allocation10 + $0x34] ss:$20 sps:$4 sm:$0xff]   ;;  %v753_v32 = vld [vmem:[#allocation10 + $0x30] ss:$20 sps:$4 sm:$0xff]   ;;  %v754_v33 = vld [vmem:[#allocation10 + $0xc] ss:$20 sps:$4 sm:$0xff]  }
  0x41   :  { %360 = vmatpush1.bf16.msra.mxu0 %v717_v8  ;;  %v86_v31 = vld [vmem:[#allocation7 + $0x8] sm:$0xff]  ;;  %v958_v37 = vmov 0.0   ;;  %v758_v38 = vld [vmem:[#allocation10 + $0x100] ss:$20 sps:$4 sm:$0xff]   ;;  %vm959_vm0 = vmmov 0   ;;  %v485_v2 = vld [vmem:[#allocation4 + $0x18] sm:$0xff] }
  0x42   :  { %361 = vmatprep.subr.bf16.mxu0 %v718_v9  ;;  %403 = vmatpush1.bf16.msra.mxu1 %v735_v15  ;;  %v98_v34 = vpack.c.bf16 %v86_v31, %v85_v30  ;;  %v757_v35 = vld [vmem:[#allocation10 + $0x128] ss:$20 sps:$4 sm:$0xff]   ;;  %v759_v39 = vld [vmem:[#allocation10 + $0xd8] ss:$20 sps:$4 sm:$0xff]   ;;  %v760_v40 = vld [vmem:[#allocation10 + $0xb0] ss:$20 sps:$4 sm:$0xff]  }
  0x43   :  { %404 = vmatprep.subr.bf16.mxu1 %v738_v16  ;;  %v756_v36 = vld [vmem:[#allocation10 + $0x8] ss:$20 sps:$4 sm:$0xff]   ;;  %v762_v42 = vld [vmem:[#allocation10 + $0x60] ss:$20 sps:$4 sm:$0xff]   ;;  %v763_v43 = vld [vmem:[#allocation10 + $0x38] ss:$20 sps:$4 sm:$0xff]  }
  0x44   :  { %v761_v41 = vld [vmem:[#allocation10 + $0x88] ss:$20 sps:$4 sm:$0xff]   ;;  %v764_v44 = vld [vmem:[#allocation10 + $0x10] ss:$20 sps:$4 sm:$0xff]   ;;  %s960_s25 = smov [#allocation12]  }
  0x45   :  { %362 = vmatpush1.bf16.msra.mxu0 %v722_v12  ;;  %v482_v45 = vld [vmem:[#allocation4] sm:$0xff]  ;;  %v483_v47 = vld [vmem:[#allocation4 + $0x8] sm:$0xff]  ;;  %v484_v62 = vld [vmem:[#allocation4 + $0x10] sm:$0xff]  ;;  %s572_s26 = sshll.u32 %s960_s25, 4  ;;  %s573_s26 = int_to_ptr.vmem [resolvable:$true] %s572_s26 }
  0x46   :  { %363 = vmatprep.subr.bf16.mxu0 %v724_v13  ;;  %405 = vmatpush1.bf16.msra.mxu1 %v741_v19  ;;  %v486_v50 = vld [vmem:[#allocation4 + $0x20] sm:$0xff]  ;;  %v487_v54 = vld [vmem:[#allocation4 + $0x28] sm:$0xff]  ;;  %v488_v1 = vld [vmem:[#allocation4 + $0x30] sm:$0xff]  ;;  %p882_p7 = scmp.lt.s32.totalorder %s573_s26, %s573_s26 }
  0x47   :  { %406 = vmatprep.subr.bf16.mxu1 %v744_v20  ;;  %v489_v10 = vld [vmem:[#allocation4 + $0x38] sm:$0xff]  ;;  %v657_v19 = vld [vmem:[%s1046_s4] ss:$0 sm:$0xff]  ;;  %s877_s4 = scalar_lea.vmem %s573_s26, 256 }
  0x48   :  { %p878_p6 = scmp.ne.s32.totalorder %s573_s26, %s877_s4  ;;  %p883_p8 = scmp.lt.s32.totalorder %s877_s4, %s877_s4 }
  0x49   :  { %364 = vmatpush1.bf16.msra.mxu0 %v728_v17 }
  0x4a   :  { %365 = vmatprep.subr.bf16.mxu0 %v730_v18  ;;  %407 = vmatpush1.bf16.msra.mxu1 %v747_v23  ;;  %p884_p9 = por %p883_p8, %p882_p7 }
  0x4b   :  { %408 = vmatprep.subr.bf16.mxu1 %v748_v24  ;;  %v89_v24 = vld [vmem:[#allocation9] sm:$0xff] }
  0x4c   :  { %p885_p10 = pnand %p884_p9, %p878_p6 }
  0x4d   :  { %366 = vmatpush1.bf16.msra.mxu0 %v734_v21 }
  0x4e   :  { %367 = vmatprep.subr.bf16.mxu0 %v736_v22  ;;  %409 = vmatpush1.bf16.msra.mxu1 %v750_v27 }
  0x4f   :  { %410 = vmatprep.subr.bf16.mxu1 %v751_v29 }
  0x51   :  { %368 = vmatpush1.bf16.msra.mxu0 %v740_v25 }
  0x52   :  { %369 = vmatprep.subr.bf16.mxu0 %v742_v26  ;;  %411 = vmatpush1.bf16.msra.mxu1 %v753_v32 }
  0x53   :  { %412 = vmatprep.subr.bf16.mxu1 %v754_v33 }
  0x55   :  { %370 = vmatpush1.bf16.msra.mxu0 %v746_v28 }
  0x56   :  { %673 = vmatprep.subr.bf16.mxu0 %v958_v37  ;;  %413 = vmatpush1.bf16.msra.mxu1 %v756_v36 }
  0x58   :  { %388 = vmatmul.mubr.bf16.vlgmr.msra.gmra.mxu0 %v98_v34 }
  0x59   :  { %674 = vmatpush3.bf16.msra.mxu0 %v757_v35  ;;  %689 = vmatprep.mubr.msk.bf16.mxu0 %vm959_vm0, %v958_v37  ;;  %v90_v35 = vld [vmem:[#allocation9 + $0x8] sm:$0xff] }
  0x5a   :  { %675 = vmatprep.subr.bf16.mxu0 %v958_v37  ;;  %431 = vmatmul.mubr.bf16.vlgmr.msra.gmra.mxu1 %v98_v34 }
  0x5d   :  { %676 = vmatpush3.bf16.msra.mxu0 %v758_v38 }
  0x5e   :  { %677 = vmatprep.subr.bf16.mxu0 %v958_v37 }
  0x61   :  { %678 = vmatpush3.bf16.msra.mxu0 %v759_v39 }
  0x62   :  { %679 = vmatprep.subr.bf16.mxu0 %v958_v37 }
  0x65   :  { %680 = vmatpush3.bf16.msra.mxu0 %v760_v40 }
  0x66   :  { %681 = vmatprep.subr.bf16.mxu0 %v958_v37 }
  0x69   :  { %682 = vmatpush3.bf16.msra.mxu0 %v761_v41 }
  0x6a   :  { %683 = vmatprep.subr.bf16.mxu0 %v958_v37 }
  0x6d   :  { %684 = vmatpush3.bf16.msra.mxu0 %v762_v42 }
  0x6e   :  { %685 = vmatprep.subr.bf16.mxu0 %v958_v37 }
  0x71   :  { %686 = vmatpush3.bf16.msra.mxu0 %v763_v43 }
  0x72   :  { %687 = vmatprep.subr.bf16.mxu0 %v958_v37 }
  0x75   :  { %688 = vmatpush3.bf16.msra.mxu0 %v764_v44 }
  0x78   :  { %690 = vmatmul.mubr.bf16.vlgmr.msra.gmra.mxu0 %v98_v34 }
 0x118   :  { %v389_v46 = vpop.f32.mrf.mxu0 }
 0x119   :  { %v490_v48 = vadd.f32 %v482_v45, %v389_v46 }
 0x11a   :  { %v391_v49 = vpop.f32.mrf.mxu0  ;;  %v432_v60 = vpop.f32.mrf.mxu1 }
 0x11b   :  { %v658_v51 = vmul.f32 -1.442695, %v490_v48  ;;  %v491_v52 = vadd.f32 %v483_v47, %v391_v49  ;;  %v492_v0 = vadd.f32 %v484_v62, %v432_v60 }
 0x11c   :  { %v393_v53 = vpop.f32.mrf.mxu0  ;;  %v434_v63 = vpop.f32.mrf.mxu1 }
 0x11d   :  { %765 = vpow2.f32 %v658_v51  ;;  %v660_v55 = vmul.f32 -1.442695, %v491_v52  ;;  %v494_v56 = vadd.f32 %v486_v50, %v393_v53  ;;  %v662_v4 = vmul.f32 -1.442695, %v492_v0 }
 0x11e   :  { %v395_v57 = vpop.f32.mrf.mxu0  ;;  %v436_v3 = vpop.f32.mrf.mxu1  ;;  %v493_v7 = vadd.f32 %v485_v2, %v434_v63 }
 0x11f   :  { %767 = vpow2.f32 %v660_v55  ;;  %v659_v58 = vmul.f32 -1.442695, %v494_v56  ;;  %v495_v59 = vadd.f32 %v487_v54, %v395_v57  ;;  %v496_v5 = vadd.f32 %v488_v1, %v436_v3 }
 0x120   :  { %v438_v9 = vpop.f32.mrf.mxu1 }
 0x121   :  { %769 = vpow2.f32 %v659_v58  ;;  %v661_v61 = vmul.f32 -1.442695, %v495_v59  ;;  %v663_v12 = vmul.f32 -1.442695, %v496_v5  ;;  %v497_v15 = vadd.f32 %v489_v10, %v438_v9 }
 0x123   :  { %771 = vpow2.f32 %v661_v61 }
 0x124   :  { %773 = vpow2.f32 %v662_v4 }
 0x12a   :  { %v766_v6 = vpop.eup %765 }
 0x12b   :  { %v514_v8 = vadd.f32 1.0, %v766_v6 }
 0x12c   :  { %v768_v11 = vpop.eup %767 }
 0x12d   :  { %775 = vrcp.f32 %v514_v8  ;;  %v526_v13 = vadd.f32 1.0, %v768_v11 }
 0x12e   :  { %v770_v14 = vpop.eup %769  ;;  %777 = vtanh.f32 %v493_v7 }
 0x12f   :  { %779 = vrcp.f32 %v526_v13  ;;  %v515_v16 = vadd.f32 1.0, %v770_v14 }
 0x130   :  { %v772_v17 = vpop.eup %771  ;;  %781 = vpow2.f32 %v663_v12 }
 0x131   :  { %783 = vrcp.f32 %v515_v16  ;;  %v527_v18 = vadd.f32 1.0, %v772_v17  ;;  %v774_v21 = vpop.eup %773 }
 0x132   :  { %785 = vtanh.f32 %v497_v15  ;;  %v538_v28 = vadd.f32 1.0, %v774_v21 }
 0x133   :  { %787 = vrcp.f32 %v527_v18 }
 0x134   :  { %789 = vrcp.f32 %v538_v28 }
 0x138   :  { %v475_v20 = vpop.f32.mrf.mxu0 }
 0x139   :  { %v504_v22 = vadd.f32 %v657_v19, %v475_v20 }
 0x13a   :  { %v776_v23 = vpop.eup %775  ;;  %v691_v25 = vpop.f32.mrf.mxu0 }
 0x13b   :  { %v778_v26 = vpop.eup %777  ;;  %506 = vst [vmem:[#allocation12] sm:$0xff] %v504_v22  ;;  %v546_v31 = vmul.f32 %v776_v23, %v89_v24 }
 0x13c   :  { %v780_v27 = vpop.eup %779  ;;  %v478_v29 = vpop.f32.mrf.mxu0 }
 0x13d   :  { %v782_v30 = vpop.eup %781  ;;  %v548_v32 = vmul.f32 %v780_v27, %v778_v26  ;;  %v505_v33 = vadd.f32 %v657_v19, %v478_v29 }
 0x13e   :  { %v784_v34 = vpop.eup %783  ;;  %v692_v36 = vpop.f32.mrf.mxu0  ;;  %v539_v40 = vadd.f32 1.0, %v782_v30 }
 0x13f   :  { %v786_v37 = vpop.eup %785  ;;  %v550_v38 = vadd.f32 %v548_v32, %v546_v31  ;;  %507 = vst [vmem:[#allocation12 + $0x8] sm:$0xff] %v505_v33 }
 0x140   :  { %v788_v39 = vpop.eup %787 }
 0x141   :  { %888 = shalt.err (!%p885_p10)
}
 0x142   :  { %578 = dma.vmem_to_hbm [thread:$0]  %s573_s26, 256, %s1047_s5, [#allocation6], %s948_s27, %s948_s27, %s949_s28   ;;  %791 = vtanh.f32 %v550_v38  ;;  %565 = vst [vmem:[#allocation15] sm:$0xff] %v550_v38  ;;  %v547_v41 = vmul.f32 %v784_v34, %v90_v35  ;;  %v549_v42 = vmul.f32 %v788_v39, %v786_v37  ;;  %v790_v44 = vpop.eup %789 }
 0x143   :  { %793 = vrcp.f32 %v539_v40  ;;  %s961_s8 = smov [#allocation13]   ;;  %s962_s10 = smov [#allocation15]  }
 0x144   :  { %v551_v43 = vadd.f32 %v549_v42, %v547_v41  ;;  %s584_s9 = sshll.u32 %s961_s8, 4  ;;  %s596_s11 = sshll.u32 %s962_s10, 4  ;;  %s585_s9 = int_to_ptr.vmem [resolvable:$true] %s584_s9  ;;  %s597_s11 = int_to_ptr.vmem [resolvable:$true] %s596_s11 }
 0x145   :  { %s897_s5 = scalar_lea.vmem %s585_s9, 256  ;;  %p902_p12 = scmp.lt.s32.totalorder %s585_s9, %s585_s9 }
 0x146   :  { %795 = vtanh.f32 %v551_v43  ;;  %566 = vst [vmem:[#allocation15 + $0x8] sm:$0xff] %v551_v43  ;;  %p898_p11 = scmp.ne.s32.totalorder %s585_s9, %s897_s5  ;;  %p903_p13 = scmp.lt.s32.totalorder %s897_s5, %s897_s5 }
 0x148   :  { %p904_p0 = por %p903_p13, %p902_p12 }
 0x14a   :  { %p905_p1 = pnand %p904_p0, %p898_p11 }
 0x14f   :  { %v792_v45 = vpop.eup %791 }
 0x150   :  { %v554_v46 = vmul.f32 %v792_v45, %v790_v44  ;;  %v794_v47 = vpop.eup %793 }
 0x152   :  { %563 = vst [vmem:[#allocation13] sm:$0xff] %v554_v46 }
 0x153   :  { %v796_v48 = vpop.eup %795 }
 0x154   :  { %v555_v49 = vmul.f32 %v796_v48, %v794_v47 }
 0x156   :  { %564 = vst [vmem:[#allocation13 + $0x8] sm:$0xff] %v555_v49 }
 0x157   :  { %908 = shalt.err (!%p905_p1)
}
 0x158   :  { %590 = dma.vmem_to_hbm [thread:$0]  %s585_s9, 256, %s1048_s6, [#allocation14], %s948_s27, %s948_s27, %s949_s28  }
 0x159   :  { %s917_s14 = scalar_lea.vmem %s597_s11, 256  ;;  %p922_p3 = scmp.lt.s32.totalorder %s597_s11, %s597_s11 }
 0x15a   :  { %p918_p2 = scmp.ne.s32.totalorder %s597_s11, %s917_s14  ;;  %p923_p4 = scmp.lt.s32.totalorder %s917_s14, %s917_s14 }
 0x15c   :  { %p924_p5 = por %p923_p4, %p922_p3 }
 0x15e   :  { %p925_p6 = pnand %p924_p5, %p918_p2 }
 0x160   :  { %928 = shalt.err (!%p925_p6)
}
 0x161   :  { %602 = dma.vmem_to_hbm [thread:$0]  %s597_s11, 256, %s1049_s7, [#allocation14], %s948_s27, %s948_s27, %s949_s28  }
 0x162   :  { %943 = dma.done.wait [#allocation6], 256  }
 0x163   :  { %944 = vsyncadd [#allocation6], 4294967040 }
 0x164   :  { %945 = dma.done.wait [#allocation14], 512  }
 0x165   :  { %946 = vsyncadd [#allocation14], 4294966784 }
 0x166   :  { %612 = vsyncpa [#allocation5], 1 }
 0x167   :  { %613 = vsyncpa [#allocation8], 1 }
 0x168   :  { %614 = vsyncpa [#allocation11], 1 }
 0x169   :  { %615 = vsyncpa [#allocation6], 1 }
 0x16a   :  { %616 = vsyncpa [#allocation14], 1 }

</bundles_post_ra>
